<compile_context>
chip_gen: v5e
topology: v5e:2x2
jax: 0.10.0
libtpu: 0.0.40
codegen_flags: <defaults>
</compile_context>

<pallas_src>
import jax
import jax.numpy as jnp
import numpy as np
from jax.experimental import pallas as pl
from jax.experimental.pallas import tpu as pltpu

# ----------------------------- configuration ------------------------------
ATOM_FLOAT_NAMES = ["van_der_waals_radis", "partial_charge", "mass"]
EMBED_DIM = 32

# default rbf_params from the PyTorch module
_RBF_PARAMS = {
    "van_der_waals_radis": (np.arange(1.0, 3.0, 0.2, dtype=np.float32), 10.0),
    "partial_charge": (np.arange(-1.0, 4.0, 0.25, dtype=np.float32), 10.0),
    "mass": (np.arange(0.0, 2.0, 0.1, dtype=np.float32), 10.0),
}
F = len(ATOM_FLOAT_NAMES)
GAMMAS = tuple(float(_RBF_PARAMS[n][1]) for n in ATOM_FLOAT_NAMES)
CENTER_COUNTS = tuple(len(_RBF_PARAMS[n][0]) for n in ATOM_FLOAT_NAMES)  # (10, 20, 20)
K_REAL = sum(CENTER_COUNTS)          # 50 real centers across all features
K_SLOT = 64                          # padded center lanes per atom slot (50 -> 64)
PACK = 4                             # atoms packed per kernel row
KTOT = PACK * K_SLOT                 # 256 rbf lanes per packed row
assert K_REAL <= K_SLOT


# ------------------------------- kernel -----------------------------------
def _atom_float_embed_kernel(x_ref, sgm_ref, sgc_ref, w_ref, b_ref, o_ref):
    """x_ref:[tile_r, 12] f32   sgm_ref:[12, KTOT] f32   sgc_ref:[1, KTOT] f32
    w_ref:[KTOT, 128] bf16   b_ref:[1, 128] f32   o_ref:[tile_r, 128] f32."""
    x = x_ref[...]
    sgm = sgm_ref[...]
    # Spread the 12 packed x columns onto the fused 256 RBF lanes, sqrt(gamma)
    # folded into the per-lane mask rows.  Static unrolled broadcast+mask FMAs:
    # VPU/XLU-only work, keeps the MXU free for the real matmul below.
    sgx = x[:, 0:1] * sgm[0:1, :]
    for j in range(1, PACK * F):
        sgx = sgx + x[:, j:j + 1] * sgm[j:j + 1, :]
    diff = sgx - sgc_ref[...]                 # sqrt(g)*x - sqrt(g)*c, per lane
    rbf = jnp.exp(-(diff * diff))             # f32 EUP; pad lanes -> exp(0)=1 -> zero weight rows
    # Single bf16 MXU pass with f32 accumulation; fused block-diagonal linear +
    # summed bias; full 128-lane (unmasked) output store.
    acc = jnp.dot(rbf.astype(w_ref.dtype), w_ref[...],
                  preferred_element_type=jnp.float32)
    o_ref[...] = acc + b_ref[...]


# ------------------------------- wrapper -----------------------------------
def _round_up(x, m):
    return (x + m - 1) // m * m


def atom_float_embedding(feats, params, *, tile_n=8192, min_grid_steps=2):
    """feats: dict name -> [N] float32.  Returns [N, embed_dim] float32."""
    x = jnp.stack([feats[name] for name in ATOM_FLOAT_NAMES], axis=-1)  # [N, F] f32
    n = x.shape[0]
    d_out = params["w_big"].shape[1]          # PACK * embed_dim
    embed_dim = d_out // PACK

    # --- tiling: pad only to a multiple of 32 atoms (8 packed sublane rows), then
    #     pick a tile so that (a) the grid has >= min_grid_steps steps when possible
    #     (v7x megacore + DMA/compute overlap) and (b) padding waste stays ~32 atoms
    #     per step instead of up to tile_n-32 (ragged-N fix).
    atom_align = PACK * 8                                   # 32 atoms
    n_pad32 = _round_up(max(n, 1), atom_align)
    max_steps = n_pad32 // atom_align
    tile_req = _round_up(max(atom_align, int(tile_n)), atom_align)
    steps = -(-n_pad32 // tile_req)                         # cdiv
    steps = min(max(steps, min_grid_steps), max_steps)
    tile_atoms = _round_up(-(-n_pad32 // steps), atom_align)
    n_pad = steps * tile_atoms

    if n_pad != n:
        x = jnp.pad(x, ((0, n_pad - n), (0, 0)))            # padded atoms sliced off below
    # Pack 4 atoms per row (free row-major reshape): [n_pad, F] -> [n_pad/4, 4F].
    xp = x.reshape(n_pad // PACK, PACK * F)
    tile_r = tile_atoms // PACK

    out_packed = pl.pallas_call(
        _atom_float_embed_kernel,
        out_shape=jax.ShapeDtypeStruct((n_pad // PACK, d_out), jnp.float32),
        grid_spec=pltpu.PrefetchScalarGridSpec(
            num_scalar_prefetch=0,
            grid=(steps,),
            in_specs=[
                pl.BlockSpec((tile_r, PACK * F), lambda i: (i, 0)),
                pl.BlockSpec((PACK * F, KTOT), lambda i: (0, 0)),
                pl.BlockSpec((1, KTOT), lambda i: (0, 0)),
                pl.BlockSpec((KTOT, d_out), lambda i: (0, 0)),
                pl.BlockSpec((1, d_out), lambda i: (0, 0)),
            ],
            out_specs=pl.BlockSpec((tile_r, d_out), lambda i: (i, 0)),
        ),
        compiler_params=pltpu.CompilerParams(
            dimension_semantics=("parallel",),
        ),
    )(xp, params["sgm"], params["sgc"], params["w_big"], params["b_big"])

    # Free row-major reshape back to per-atom embeddings, drop padded atoms.
    return out_packed.reshape(n_pad, embed_dim)[:n]


# ------------------------- deterministic parameters -------------------------
def make_params(key, embed_dim=EMBED_DIM):
    """Build fused (lane-packed) kernel params + raw per-feature params for the ref."""
    keys = jax.random.split(key, 2 * F)
    offs = np.concatenate([[0], np.cumsum(CENTER_COUNTS)])[:-1].astype(np.int64)

    sgm = np.zeros((PACK * F, KTOT), np.float32)             # per-lane sqrt(gamma) mask
    sgc = np.zeros((1, KTOT), np.float32)                    # per-lane sqrt(gamma)*center
    w_big = np.zeros((KTOT, PACK * embed_dim), np.float32)   # block-diagonal fused weight
    b_big = np.zeros((1, PACK * embed_dim), np.float32)
    bias_sum = np.zeros((embed_dim,), np.float32)

    raw_c, raw_w, raw_b = [], [], []
    for f, name in enumerate(ATOM_FLOAT_NAMES):
        c, gamma = _RBF_PARAMS[name]
        k = len(c)
        # PyTorch nn.Linear default init: U(-1/sqrt(fan_in), 1/sqrt(fan_in))
        bound = 1.0 / np.sqrt(k)
        w = np.asarray(jax.random.uniform(keys[2 * f], (k, embed_dim), jnp.float32, -bound, bound))
        b = np.asarray(jax.random.uniform(keys[2 * f + 1], (embed_dim,), jnp.float32, -bound, bound))
        raw_c.append(jnp.asarray(c))
        raw_w.append(jnp.asarray(w))
        raw_b.append(jnp.asarray(b))
        bias_sum += b

        sg = np.float32(np.sqrt(gamma))
        for s in range(PACK):
            base = s * K_SLOT + offs[f]
            sgm[s * F + f, base:base + k] = sg
            sgc[0, base:base + k] = sg * c
            w_big[base:base + k, s * embed_dim:(s + 1) * embed_dim] = w
            # padded lanes (beyond the real centers) keep zero weight rows -> contribute 0

    for s in range(PACK):
        b_big[0, s * embed_dim:(s + 1) * embed_dim] = bias_sum

    return {
        "sgm": jnp.asarray(sgm),
        "sgc": jnp.asarray(sgc),
        "w_big": jnp.asarray(w_big, dtype=jnp.bfloat16),     # bf16 MXU operand
        "b_big": jnp.asarray(b_big),
        "raw": {"centers": raw_c, "weights": raw_w, "biases": raw_b},
    }


# ------------------------------ reference ----------------------------------
def atom_float_embedding_ref(feats, raw):
    out = 0.0
    for f, name in enumerate(ATOM_FLOAT_NAMES):
        x = feats[name]
        c = raw["centers"][f]
        rbf = jnp.exp(-GAMMAS[f] * (x[:, None] - c[None, :]) ** 2)
        out = out + rbf @ raw["weights"][f] + raw["biases"][f][None, :]
    return out


# --------------------------------- main -------------------------------------
if __name__ == "__main__":
    N = 200  # ragged atom count: exercises padding + multi-step grid
    key = jax.random.PRNGKey(0)
    k_feat, k_param = jax.random.split(key)
    fk = jax.random.split(k_feat, F)
    feats = {
        "van_der_waals_radis": jax.random.uniform(fk[0], (N,), jnp.float32, 1.0, 3.0),
        "partial_charge": jax.random.uniform(fk[1], (N,), jnp.float32, -1.0, 4.0),
        "mass": jax.random.uniform(fk[2], (N,), jnp.float32, 0.0, 2.0),
    }
    params = make_params(k_param, EMBED_DIM)

    # small tile so the test runs a multi-step pipelined grid; production default is 8192
    out = atom_float_embedding(feats, params, tile_n=64)
    out = jax.block_until_ready(out)

    ref = atom_float_embedding_ref(feats, params["raw"])
    # bf16 MXU operands (rbf, fused weight) -> ~1e-3-level error vs the f32 reference.
    np.testing.assert_allclose(np.asarray(out), np.asarray(ref), rtol=3e-2, atol=3e-2)
    print("KERNEL_OK")
</pallas_src>

<mosaic_0001>
module attributes {stable_mosaic.version = 11 : i64} {
  func.func @_atom_float_embed_kernel(%arg0: i32, %arg1: memref<16x12xf32, #tpu.memory_space<vmem>>, %arg2: memref<12x256xf32, #tpu.memory_space<vmem>>, %arg3: memref<1x256xf32, #tpu.memory_space<vmem>>, %arg4: memref<256x128xbf16, #tpu.memory_space<vmem>>, %arg5: memref<1x128xf32, #tpu.memory_space<vmem>>, %arg6: memref<16x128xf32, #tpu.memory_space<vmem>>) attributes {dimension_semantics = [#tpu.dimension_semantics<parallel>], iteration_bounds = array<i64: 4>, scalar_prefetch = 0 : i64, scratch_operands = 0 : i64, tpu.core_type = #tpu.core_type<tc>, window_params = [{transform_indices = @transform_0, window_bounds = array<i64: 16, 12>}, {pipeline_mode = #tpu.pipeline_mode<synchronous>, transform_indices = @transform_1, window_bounds = array<i64: 12, 256>}, {pipeline_mode = #tpu.pipeline_mode<synchronous>, transform_indices = @transform_2, window_bounds = array<i64: 1, 256>}, {pipeline_mode = #tpu.pipeline_mode<synchronous>, transform_indices = @transform_3, window_bounds = array<i64: 256, 128>}, {pipeline_mode = #tpu.pipeline_mode<synchronous>, transform_indices = @transform_4, window_bounds = array<i64: 1, 128>}, {transform_indices = @transform_5, window_bounds = array<i64: 16, 128>}]} {
    %c0 = arith.constant 0 : index
    %c0_0 = arith.constant 0 : index
    %0 = vector.load %arg1[%c0, %c0_0] : memref<16x12xf32, #tpu.memory_space<vmem>>, vector<16x12xf32>
    %c0_1 = arith.constant 0 : index
    %c0_2 = arith.constant 0 : index
    %1 = vector.load %arg2[%c0_1, %c0_2] : memref<12x256xf32, #tpu.memory_space<vmem>>, vector<12x256xf32>
    %2 = vector.extract_strided_slice %0 {offsets = [0, 0], sizes = [16, 1], strides = [1, 1]} : vector<16x12xf32> to vector<16x1xf32>
    %3 = vector.extract_strided_slice %1 {offsets = [0, 0], sizes = [1, 256], strides = [1, 1]} : vector<12x256xf32> to vector<1x256xf32>
    %4 = vector.broadcast %2 : vector<16x1xf32> to vector<16x256xf32>
    %5 = vector.broadcast %3 : vector<1x256xf32> to vector<16x256xf32>
    %6 = arith.mulf %4, %5 : vector<16x256xf32>
    %7 = vector.extract_strided_slice %0 {offsets = [0, 1], sizes = [16, 1], strides = [1, 1]} : vector<16x12xf32> to vector<16x1xf32>
    %8 = vector.extract_strided_slice %1 {offsets = [1, 0], sizes = [1, 256], strides = [1, 1]} : vector<12x256xf32> to vector<1x256xf32>
    %9 = vector.broadcast %7 : vector<16x1xf32> to vector<16x256xf32>
    %10 = vector.broadcast %8 : vector<1x256xf32> to vector<16x256xf32>
    %11 = arith.mulf %9, %10 : vector<16x256xf32>
    %12 = arith.addf %6, %11 : vector<16x256xf32>
    %13 = vector.extract_strided_slice %0 {offsets = [0, 2], sizes = [16, 1], strides = [1, 1]} : vector<16x12xf32> to vector<16x1xf32>
    %14 = vector.extract_strided_slice %1 {offsets = [2, 0], sizes = [1, 256], strides = [1, 1]} : vector<12x256xf32> to vector<1x256xf32>
    %15 = vector.broadcast %13 : vector<16x1xf32> to vector<16x256xf32>
    %16 = vector.broadcast %14 : vector<1x256xf32> to vector<16x256xf32>
    %17 = arith.mulf %15, %16 : vector<16x256xf32>
    %18 = arith.addf %12, %17 : vector<16x256xf32>
    %19 = vector.extract_strided_slice %0 {offsets = [0, 3], sizes = [16, 1], strides = [1, 1]} : vector<16x12xf32> to vector<16x1xf32>
    %20 = vector.extract_strided_slice %1 {offsets = [3, 0], sizes = [1, 256], strides = [1, 1]} : vector<12x256xf32> to vector<1x256xf32>
    %21 = vector.broadcast %19 : vector<16x1xf32> to vector<16x256xf32>
    %22 = vector.broadcast %20 : vector<1x256xf32> to vector<16x256xf32>
    %23 = arith.mulf %21, %22 : vector<16x256xf32>
    %24 = arith.addf %18, %23 : vector<16x256xf32>
    %25 = vector.extract_strided_slice %0 {offsets = [0, 4], sizes = [16, 1], strides = [1, 1]} : vector<16x12xf32> to vector<16x1xf32>
    %26 = vector.extract_strided_slice %1 {offsets = [4, 0], sizes = [1, 256], strides = [1, 1]} : vector<12x256xf32> to vector<1x256xf32>
    %27 = vector.broadcast %25 : vector<16x1xf32> to vector<16x256xf32>
    %28 = vector.broadcast %26 : vector<1x256xf32> to vector<16x256xf32>
    %29 = arith.mulf %27, %28 : vector<16x256xf32>
    %30 = arith.addf %24, %29 : vector<16x256xf32>
    %31 = vector.extract_strided_slice %0 {offsets = [0, 5], sizes = [16, 1], strides = [1, 1]} : vector<16x12xf32> to vector<16x1xf32>
    %32 = vector.extract_strided_slice %1 {offsets = [5, 0], sizes = [1, 256], strides = [1, 1]} : vector<12x256xf32> to vector<1x256xf32>
    %33 = vector.broadcast %31 : vector<16x1xf32> to vector<16x256xf32>
    %34 = vector.broadcast %32 : vector<1x256xf32> to vector<16x256xf32>
    %35 = arith.mulf %33, %34 : vector<16x256xf32>
    %36 = arith.addf %30, %35 : vector<16x256xf32>
    %37 = vector.extract_strided_slice %0 {offsets = [0, 6], sizes = [16, 1], strides = [1, 1]} : vector<16x12xf32> to vector<16x1xf32>
    %38 = vector.extract_strided_slice %1 {offsets = [6, 0], sizes = [1, 256], strides = [1, 1]} : vector<12x256xf32> to vector<1x256xf32>
    %39 = vector.broadcast %37 : vector<16x1xf32> to vector<16x256xf32>
    %40 = vector.broadcast %38 : vector<1x256xf32> to vector<16x256xf32>
    %41 = arith.mulf %39, %40 : vector<16x256xf32>
    %42 = arith.addf %36, %41 : vector<16x256xf32>
    %43 = vector.extract_strided_slice %0 {offsets = [0, 7], sizes = [16, 1], strides = [1, 1]} : vector<16x12xf32> to vector<16x1xf32>
    %44 = vector.extract_strided_slice %1 {offsets = [7, 0], sizes = [1, 256], strides = [1, 1]} : vector<12x256xf32> to vector<1x256xf32>
    %45 = vector.broadcast %43 : vector<16x1xf32> to vector<16x256xf32>
    %46 = vector.broadcast %44 : vector<1x256xf32> to vector<16x256xf32>
    %47 = arith.mulf %45, %46 : vector<16x256xf32>
    %48 = arith.addf %42, %47 : vector<16x256xf32>
    %49 = vector.extract_strided_slice %0 {offsets = [0, 8], sizes = [16, 1], strides = [1, 1]} : vector<16x12xf32> to vector<16x1xf32>
    %50 = vector.extract_strided_slice %1 {offsets = [8, 0], sizes = [1, 256], strides = [1, 1]} : vector<12x256xf32> to vector<1x256xf32>
    %51 = vector.broadcast %49 : vector<16x1xf32> to vector<16x256xf32>
    %52 = vector.broadcast %50 : vector<1x256xf32> to vector<16x256xf32>
    %53 = arith.mulf %51, %52 : vector<16x256xf32>
    %54 = arith.addf %48, %53 : vector<16x256xf32>
    %55 = vector.extract_strided_slice %0 {offsets = [0, 9], sizes = [16, 1], strides = [1, 1]} : vector<16x12xf32> to vector<16x1xf32>
    %56 = vector.extract_strided_slice %1 {offsets = [9, 0], sizes = [1, 256], strides = [1, 1]} : vector<12x256xf32> to vector<1x256xf32>
    %57 = vector.broadcast %55 : vector<16x1xf32> to vector<16x256xf32>
    %58 = vector.broadcast %56 : vector<1x256xf32> to vector<16x256xf32>
    %59 = arith.mulf %57, %58 : vector<16x256xf32>
    %60 = arith.addf %54, %59 : vector<16x256xf32>
    %61 = vector.extract_strided_slice %0 {offsets = [0, 10], sizes = [16, 1], strides = [1, 1]} : vector<16x12xf32> to vector<16x1xf32>
    %62 = vector.extract_strided_slice %1 {offsets = [10, 0], sizes = [1, 256], strides = [1, 1]} : vector<12x256xf32> to vector<1x256xf32>
    %63 = vector.broadcast %61 : vector<16x1xf32> to vector<16x256xf32>
    %64 = vector.broadcast %62 : vector<1x256xf32> to vector<16x256xf32>
    %65 = arith.mulf %63, %64 : vector<16x256xf32>
    %66 = arith.addf %60, %65 : vector<16x256xf32>
    %67 = vector.extract_strided_slice %0 {offsets = [0, 11], sizes = [16, 1], strides = [1, 1]} : vector<16x12xf32> to vector<16x1xf32>
    %68 = vector.extract_strided_slice %1 {offsets = [11, 0], sizes = [1, 256], strides = [1, 1]} : vector<12x256xf32> to vector<1x256xf32>
    %69 = vector.broadcast %67 : vector<16x1xf32> to vector<16x256xf32>
    %70 = vector.broadcast %68 : vector<1x256xf32> to vector<16x256xf32>
    %71 = arith.mulf %69, %70 : vector<16x256xf32>
    %72 = arith.addf %66, %71 : vector<16x256xf32>
    %c0_3 = arith.constant 0 : index
    %c0_4 = arith.constant 0 : index
    %73 = vector.load %arg3[%c0_3, %c0_4] : memref<1x256xf32, #tpu.memory_space<vmem>>, vector<1x256xf32>
    %74 = vector.broadcast %73 : vector<1x256xf32> to vector<16x256xf32>
    %75 = arith.subf %72, %74 : vector<16x256xf32>
    %76 = arith.mulf %75, %75 : vector<16x256xf32>
    %cst = arith.constant 0.000000e+00 : f32
    %77 = vector.broadcast %cst : f32 to vector<16x256xf32>
    %78 = arith.subf %77, %76 : vector<16x256xf32>
    %79 = math.exp %78 : vector<16x256xf32>
    %80 = arith.truncf %79 : vector<16x256xf32> to vector<16x256xbf16>
    %c0_5 = arith.constant 0 : index
    %c0_6 = arith.constant 0 : index
    %81 = vector.load %arg4[%c0_5, %c0_6] : memref<256x128xbf16, #tpu.memory_space<vmem>>, vector<256x128xbf16>
    %cst_7 = arith.constant dense<0.000000e+00> : vector<16x128xf32>
    %82 = tpu.matmul %80, %81, %cst_7 {dimension_numbers = #tpu.dot_dimension_numbers<[1], [0], [0], [1], [0, 0, 1, 1], [], []>} : vector<16x256xbf16>, vector<256x128xbf16>, vector<16x128xf32> -> vector<16x128xf32>
    %c0_8 = arith.constant 0 : index
    %c0_9 = arith.constant 0 : index
    %83 = vector.load %arg5[%c0_8, %c0_9] : memref<1x128xf32, #tpu.memory_space<vmem>>, vector<1x128xf32>
    %84 = vector.broadcast %83 : vector<1x128xf32> to vector<16x128xf32>
    %85 = arith.addf %82, %84 : vector<16x128xf32>
    %c0_10 = arith.constant 0 : index
    %c0_11 = arith.constant 0 : index
    %86 = vector.load %arg6[%c0_10, %c0_11] : memref<16x128xf32, #tpu.memory_space<vmem>>, vector<16x128xf32>
    tpu.vector_store %arg6[%c0_10, %c0_11], %85 {strides = array<i32>} : memref<16x128xf32, #tpu.memory_space<vmem>>, vector<16x128xf32>,
    return
  }
  func.func @transform_0(%arg0: i32) -> (i32, i32) {
    %c0_i32 = arith.constant 0 : i32
    %c0_i32_0 = arith.constant 0 : i32
    return %arg0, %c0_i32 : i32, i32
  }
  func.func @transform_1(%arg0: i32) -> (i32, i32) {
    %c0_i32 = arith.constant 0 : i32
    %c0_i32_0 = arith.constant 0 : i32
    %c0_i32_1 = arith.constant 0 : i32
    return %c0_i32, %c0_i32_0 : i32, i32
  }
  func.func @transform_2(%arg0: i32) -> (i32, i32) {
    %c0_i32 = arith.constant 0 : i32
    %c0_i32_0 = arith.constant 0 : i32
    %c0_i32_1 = arith.constant 0 : i32
    return %c0_i32, %c0_i32_0 : i32, i32
  }
  func.func @transform_3(%arg0: i32) -> (i32, i32) {
    %c0_i32 = arith.constant 0 : i32
    %c0_i32_0 = arith.constant 0 : i32
    %c0_i32_1 = arith.constant 0 : i32
    return %c0_i32, %c0_i32_0 : i32, i32
  }
  func.func @transform_4(%arg0: i32) -> (i32, i32) {
    %c0_i32 = arith.constant 0 : i32
    %c0_i32_0 = arith.constant 0 : i32
    %c0_i32_1 = arith.constant 0 : i32
    return %c0_i32, %c0_i32_0 : i32, i32
  }
  func.func @transform_5(%arg0: i32) -> (i32, i32) {
    %c0_i32 = arith.constant 0 : i32
    %c0_i32_0 = arith.constant 0 : i32
    return %arg0, %c0_i32 : i32, i32
  }
}

</mosaic_0001>

<bundles_post_ra>
// kernel: tpu_custom_call.1
= control target key start
LH: loop header
LB: loop body
LE: loop exit
PB: predicated region body
PF: predicated region fallthrough
CT: control target
= control target key end

     0   :  { %10 = vsyncpa [#allocation3], 0  ;;  %s1248_s0 = inlined_call_operand.vmem [shape: f32[64,12], index: 0, kind: input, shape index: {}]   ;;  %s1249_s1 = inlined_call_operand.vmem [shape: f32[12,256], index: 1, kind: input, shape index: {}]   ;;  %s1250_s2 = inlined_call_operand.vmem [shape: f32[1,256], index: 2, kind: input, shape index: {}]   ;;  %s1251_s3 = inlined_call_operand.hbm [shape: bf16[256,128], index: 3, kind: input, shape index: {}]   ;;  %s1252_s4 = inlined_call_operand.vmem [shape: f32[1,128], index: 4, kind: input, shape index: {}]   ;;  %s1253_s5 = inlined_call_operand.hbm [shape: f32[64,128], index: 5, kind: output, shape index: {}]  }
   0x1   :  { %11 = vsyncpa [#allocation4], 0 }
   0x2   :  { %13 = vsyncpa [#allocation4 + $0x1], 0  ;;  %s1080_s18 = smov 0   ;;  %s1082_s19 = smov 0  }
   0x3   :  { %s1084_s20 = smov 0   ;;  %s1086_s21 = smov 0  }
   0x4 LB: > { %s1101_s22 = sadd.s32 4294967295, %s1031_s21   ;;  %s743_s23 = sadd.s32 4294967294, %s1031_s21   ;;  %s1031_s21 = sphi %s1086_s21, %s1259_s21   ;;  %s1027_s20 = sphi %s1084_s20, %s1258_s20   ;;  %s1023_s19 = sphi %s1082_s19, %s1257_s19   ;;  %s1019_s18 = sphi %s1080_s18, %s1256_s18  }
   0x5   : > { %s1105_s24 = sadd.s32 1, %s1031_s21   ;;  %s136_s25 = sadd.s32 1, %s1027_s20 }
   0x6   : > { %s133_s26 = ssub.s32 %s1031_s21, %s1105_s24  ;;  %p146_p0 = scmp.ne.s32.totalorder %s1027_s20, %s1023_s19 }
   0x7   : > { %p134_p1 = scmp.eq.s32.totalorder %s133_s26, 0  ;;  %p147_p2 = scmp.eq.s32.totalorder %s1101_s22, 3 }
   0x8   : > { %p152_p3 = scmp.ne.s32.totalorder %s1023_s19, %s1019_s18  ;;  %p153_p4 = scmp.eq.s32.totalorder %s743_s23, 3 }
   0x9   : > { %s1116_s27 = scalar_select %p134_p1, %s1027_s20, %s136_s25  }
   0xa   : > { %p1118_p5 = por %p147_p2, %p146_p0  ;;  %p1122_p6 = por %p153_p4, %p152_p3 }
   0xb   : > { %p744_p7 = scmp.ge.s32.totalorder %s1031_s21, 1  ;;  %p160_p8 = scmp.lt.s32.totalorder %s1031_s21, 5 }
   0xc   : > { %p852_p9 = scmp.eq.s32.totalorder %s1101_s22, 0  ;;  %s177_s7 = sshll.u32 %s1251_s3, 4  ;;  %s178_s7 = int_to_ptr.hbm [resolvable:$true] %s177_s7 }
   0xd   : > { %p161_p10 = pnand %p744_p7, %p160_p8  ;;  %s1033_s8 = smov [#allocation2]  }
   0xe   : > { %s179_s9 = sshll.u32 %s1033_s8, 4  ;;  %s1034_s10 = smov 64   ;;  %s180_s9 = int_to_ptr.vmem [resolvable:$true] %s179_s9 }
   0xf   : > { %p844_p11 = pneg %p161_p10  ;;  %s1035_s11 = smov 4  }
  0x10   : > { %207 = sbr.rel (%p161_p10) target bundleno = 378 (0x17a), region = 40 }
  0x11   : > { %p845_p12 = pnand %p852_p9, %p844_p11 }
  0x13   : > { %847 = dma.hbm_to_vmem [thread:$0]  (!%p845_p12), %s178_s7, 2048, %s180_s9, [#allocation3], %s1034_s10, %s1034_s10, %s1035_s11  }
  0x15   : > { %1010 = dma.done.wait (%p852_p9), [#allocation3], 2048  }
  0x16   : > { %1012 = vsyncadd (%p852_p9), [#allocation3], 4294965248  ;;  %s750_s12 = sshll.u32 %s1101_s22, 1  ;;  %v1036_v0 = vmov 1   ;;  %v1037_v1 = vmov 0   ;;  %v1038_v2 = vmov 2  }
  0x17   : > { %905 = vset.pattern.permute.xlu1 %v1036_v0  ;;  %904 = vset.pattern.permute.xlu0 %v1037_v1  ;;  %p237_p13 = scmp.lt.s32.totalorder %s750_s12, 7  ;;  %v1039_v5 = vmov 3   ;;  %v1040_v6 = vmov 4   ;;  %v1041_v7 = vmov 5   ;;  %v1042_v8 = vmov 6   ;;  %v828_v22 = vld [vmem:[#allocation2 + $0x38] sm:$0xff] }
  0x18   : > { %906 = vset.pattern.permute.xlu2 %v1038_v2  ;;  %v1043_v9 = vmov 8   ;;  %v1044_v10 = vmov 7   ;;  %v1045_v11 = vmov 10   ;;  %v1046_v12 = vmov 11   ;;  %v836_v23 = vld [vmem:[#allocation2 + $0x78] sm:$0xff]  ;;  %623 = vmatpush.bf16.msra.mxu0 %v828_v22  ;;  %v1151_v27 = vld [vmem:[%s1249_s1] sm:$0xff] }
  0x19   : > { %s1261_s12 = smov (!%p237_p13, %s750_s12), 7  ;;  %v1047_v13 = vmov 9   ;;  %637 = vmatpush.bf16.msra.mxu1 %v836_v23  ;;  %v1156_v28 = vld [vmem:[%s1249_s1 + $0x8] sm:$0xff]  ;;  %v827_v29 = vld [vmem:[#allocation2 + $0x30] sm:$0xff]  ;;  %v273_v31 = vperm.slane %v1151_v27, 1  ;;  %v259_v33 = vperm.slane %v1151_v27, 0 }
  0x1a   : > { %s751_s13 = sshll.u32 %s1261_s12, 3  ;;  %v835_v30 = vld [vmem:[#allocation2 + $0x70] sm:$0xff]  ;;  %v274_v32 = vperm.slane %v1156_v28, 1  ;;  %v260_v34 = vperm.slane %v1156_v28, 0  ;;  %v291_v37 = vperm.slane %v1151_v27, 2  ;;  %v826_v43 = vld [vmem:[#allocation2 + $0x28] sm:$0xff] }
  0x1b   : > { %s240_s16 = scalar_lea.vmem %s1248_s0, %s751_s13  ;;  %v834_v44 = vld [vmem:[#allocation2 + $0x68] sm:$0xff]  ;;  %v292_v49 = vperm.slane %v1156_v28, 2  ;;  %v309_v50 = vperm.slane %v1151_v27, 3  ;;  %v310_v51 = vperm.slane %v1156_v28, 3  ;;  %v825_v54 = vld [vmem:[#allocation2 + $0x20] sm:$0xff]  ;;  %v327_v59 = vperm.slane %v1151_v27, 4 }
  0x1c   : > { %v243_v3 = vld [vmem:[%s240_s16] sm:$0xff]  ;;  %v244_v4 = vld [vmem:[%s240_s16 + $0x8] sm:$0xff]  ;;  %624 = vmatpush.bf16.msra.mxu0 %v827_v29  ;;  %v328_v61 = vperm.slane %v1156_v28, 4  ;;  %v363_v23 = vperm.slane %v1151_v27, 6  ;;  %s233_s11 = sand.u32 1, %s1023_s19   ;;  %s837_s15 = sshll.u32 %s1101_s22, 4 }
  0x1d   : > { %266 = vperm.xlu1 %905, %v243_v3   ;;  %251 = vperm.xlu0 %904, %v243_v3   ;;  %v833_v55 = vld [vmem:[#allocation2 + $0x60] sm:$0xff]  ;;  %s749_s14 = sshll.u32 %s233_s11, 4  ;;  %s665_s25 = scalar_lea.hbm %s1253_s5, %s837_s15 }
  0x1e   : > { %284 = vperm.xlu2 %906, %v243_v3   ;;  %638 = vmatpush.bf16.msra.mxu1 %v835_v30  ;;  %s235_s16 = scalar_lea.vmem [#allocation5], %s749_s14  ;;  %s668_s30 = sshll.u32 %s665_s25, 4  ;;  %s669_s30 = int_to_ptr.hbm [resolvable:$true] %s668_s30 }
  0x1f   : > { %s666_s26 = sshll.u32 %s235_s16, 4  ;;  %s654_s6 = scalar_lea.sflag [#allocation4], %s233_s11  ;;  %s667_s26 = int_to_ptr.vmem [resolvable:$true] %s666_s26 }
  0x20   : > { %625 = vmatpush.bf16.msra.mxu0 %v826_v43  ;;  %s979_s7 = sshra.s32 %s669_s30, 4  ;;  %s985_s10 = scalar_lea.hbm %s1253_s5, 64  ;;  %s980_s7 = int_to_ptr.hbm [resolvable:$true] %s979_s7 }
  0x21   : > { %s981_s22 = scalar_lea.hbm %s980_s7, 16  ;;  %p986_p3 = scmp.lt.s32.totalorder %s980_s7, %s1253_s5 }
  0x22   : > { %639 = vmatpush.bf16.msra.mxu1 %v834_v44  ;;  %p982_p0 = scmp.ne.s32.totalorder %s980_s7, %s981_s22  ;;  %p987_p4 = scmp.lt.s32.totalorder %s985_s10, %s981_s22 }
  0x24   : > { %626 = vmatpush.bf16.msra.mxu0 %v825_v54  ;;  %p983_p1 = pnand %p982_p0, %p1118_p5  ;;  %p988_p7 = por %p987_p4, %p986_p3 }
  0x25   : > { %270 = vperm.xlu1 %905, %v244_v4   ;;  %256 = vperm.xlu0 %904, %v244_v4  }
  0x26   : > { %288 = vperm.xlu2 %906, %v244_v4   ;;  %640 = vmatpush.bf16.msra.mxu1 %v833_v55  ;;  %v821_v55 = vld [vmem:[#allocation2] sm:$0xff]  ;;  %p984_p2 = pneg %p983_p1 }
  0x28   : > { %p989_p8 = pnand %p988_p7, %p984_p2 }
  0x2d   : > { %908 = vset.pattern.permute.xlu1 %v1039_v5  ;;  %907 = vset.pattern.permute.xlu0 %v1039_v5 }
  0x2e   : > { %306 = vperm.xlu1 %908, %v244_v4   ;;  %302 = vperm.xlu0 %907, %v243_v3  }
  0x2f   : > { %909 = vset.pattern.permute.xlu2 %v1040_v6 }
  0x30   : > { %320 = vperm.xlu2 %909, %v243_v3  }
  0x36   : > { %910 = vset.pattern.permute.xlu1 %v1040_v6  ;;  %912 = vset.pattern.permute.xlu0 %v1041_v7 }
  0x37   : > { %324 = vperm.xlu1 %910, %v244_v4   ;;  %342 = vperm.xlu0 %912, %v244_v4  }
  0x38   : > { %911 = vset.pattern.permute.xlu2 %v1041_v7 }
  0x39   : > { %338 = vperm.xlu2 %911, %v243_v3  }
  0x3f   : > { %913 = vset.pattern.permute.xlu1 %v1042_v8  ;;  %917 = vset.pattern.permute.xlu0 %v1043_v9 }
  0x40   : > { %356 = vperm.xlu1 %913, %v243_v3   ;;  %392 = vperm.xlu0 %917, %v243_v3  }
  0x41   : > { %914 = vset.pattern.permute.xlu2 %v1042_v8 }
  0x42   : > { %360 = vperm.xlu2 %914, %v244_v4  }
  0x48   : > { %915 = vset.pattern.permute.xlu1 %v1044_v10  ;;  %922 = vset.pattern.permute.xlu0 %v1045_v11 }
  0x49   : > { %374 = vperm.xlu1 %915, %v243_v3   ;;  %432 = vperm.xlu0 %922, %v244_v4  }
  0x4a   : > { %916 = vset.pattern.permute.xlu2 %v1044_v10 }
  0x4b   : > { %378 = vperm.xlu2 %916, %v244_v4  }
  0x51   : > { %918 = vset.pattern.permute.xlu1 %v1043_v9  ;;  %925 = vset.pattern.permute.xlu0 %v1046_v12 }
  0x52   : > { %396 = vperm.xlu1 %918, %v244_v4  }
  0x53   : > { %919 = vset.pattern.permute.xlu2 %v1047_v13 }
  0x54   : > { %410 = vperm.xlu2 %919, %v243_v3  }
  0x5a   : > { %920 = vset.pattern.permute.xlu1 %v1047_v13 }
  0x5b   : > { %414 = vperm.xlu1 %920, %v244_v4  }
  0x5c   : > { %921 = vset.pattern.permute.xlu2 %v1045_v11  ;;  %v824_v11 = vld [vmem:[#allocation2 + $0x18] sm:$0xff] }
  0x5d   : > { %428 = vperm.xlu2 %921, %v243_v3   ;;  %627 = vmatpush.bf16.msra.mxu0 %v824_v11 }
  0x63   : > { %923 = vset.pattern.permute.xlu1 %v1046_v12 }
  0x64   : > { %446 = vperm.xlu1 %923, %v243_v3  }
  0x65   : > { %924 = vset.pattern.permute.xlu2 %v1046_v12  ;;  %v832_v12 = vld [vmem:[#allocation2 + $0x58] sm:$0xff] }
  0x66   : > { %450 = vperm.xlu2 %924, %v244_v4   ;;  %641 = vmatpush.bf16.msra.mxu1 %v832_v12 }
  0x78   : > { %v285_v14 = vpop.permute.xlu2 %284 }
  0x79   : > { %v293_v1 = vmul.f32 %v291_v37, %v285_v14  ;;  %v294_v2 = vmul.f32 %v292_v49, %v285_v14 }
  0x80   : > { %v289_v15 = vpop.permute.xlu2 %288 }
  0x81   : > { %v295_v56 = vmul.f32 %v291_v37, %v289_v15  ;;  %v296_v60 = vmul.f32 %v292_v49, %v289_v15  ;;  %v381_v37 = vperm.slane %v1151_v27, 7  ;;  %v830_v49 = vld [vmem:[#allocation2 + $0x48] sm:$0xff] }
  0x8a   : > { %v1142_v17 = vpop.permute.xlu2 %320 }
  0x8f   : > { %v267_v16 = vpop.permute.xlu1 %266  ;;  %v252_v19 = vpop.permute.xlu0 %251 }
  0x90   : > { %v275_v45 = vmul.f32 %v273_v31, %v267_v16  ;;  %v276_v46 = vmul.f32 %v274_v32, %v267_v16  ;;  %v261_v47 = vmul.f32 %v259_v33, %v252_v19  ;;  %v262_v48 = vmul.f32 %v260_v34, %v252_v19 }
  0x91   : > { %v345_v16 = vperm.slane %v1151_v27, 5 }
  0x92   : > { %v279_v57 = vadd.f32 %v275_v45, %v261_v47  ;;  %v280_v58 = vadd.f32 %v276_v46, %v262_v48  ;;  %v1187_v45 = vld [vmem:[%s1249_s1 + $0x10] sm:$0xf] }
  0x93   : > { %v1144_v20 = vpop.permute.xlu2 %338 }
  0x94   : > { %v297_v13 = vadd.f32 %v293_v1, %v279_v57  ;;  %v298_v15 = vadd.f32 %v294_v2, %v280_v58  ;;  %v417_v1 = vperm.slane %v1187_v45, 1 }
  0x97   : > { %v271_v18 = vpop.permute.xlu1 %270  ;;  %v257_v24 = vpop.permute.xlu0 %256 }
  0x98   : > { %v277_v39 = vmul.f32 %v273_v31, %v271_v18  ;;  %v278_v40 = vmul.f32 %v274_v32, %v271_v18  ;;  %v263_v41 = vmul.f32 %v259_v33, %v257_v24  ;;  %v264_v42 = vmul.f32 %v260_v34, %v257_v24  ;;  %v823_v32 = vld [vmem:[#allocation2 + $0x10] sm:$0xff] }
  0x99   : > { %v346_v18 = vperm.slane %v1156_v28, 5  ;;  %v364_v24 = vperm.slane %v1156_v28, 6  ;;  %v831_v33 = vld [vmem:[#allocation2 + $0x50] sm:$0xff]  ;;  %v329_v34 = vmul.f32 %v327_v59, %v1142_v17  ;;  %628 = vmatpush.bf16.msra.mxu0 %v823_v32 }
  0x9a   : > { %v281_v52 = vadd.f32 %v277_v39, %v263_v41  ;;  %v282_v53 = vadd.f32 %v278_v40, %v264_v42  ;;  %v382_v39 = vperm.slane %v1156_v28, 7  ;;  %642 = vmatpush.bf16.msra.mxu1 %v831_v33  ;;  %v347_v41 = vmul.f32 %v345_v16, %v1144_v20  ;;  %v463_v33 = vld [vmem:[%s1250_s2] sm:$0x3] }
  0x9b   : > { %v348_v42 = vmul.f32 %v346_v18, %v1144_v20  ;;  %v822_v20 = vld [vmem:[#allocation2 + $0x8] sm:$0xff] }
  0x9c   : > { %v1146_v25 = vpop.permute.xlu2 %360  ;;  %v299_v7 = vadd.f32 %v295_v56, %v281_v52  ;;  %v300_v8 = vadd.f32 %v296_v60, %v282_v53  ;;  %v399_v53 = vperm.slane %v1187_v45, 0  ;;  %v829_v56 = vld [vmem:[#allocation2 + $0x40] sm:$0xff] }
  0x9d   : > { %v367_v27 = vmul.f32 %v363_v23, %v1146_v25  ;;  %v368_v28 = vmul.f32 %v364_v24, %v1146_v25  ;;  %629 = vmatpush.bf16.msra.mxu0 %v822_v20 }
  0x9e   : > { %643 = vmatpush.bf16.msra.mxu1 %v830_v49 }
  0xa0   : > { %v307_v21 = vpop.permute.xlu1 %306  ;;  %v303_v35 = vpop.permute.xlu0 %302 }
  0xa1   : > { %v313_v62 = vmul.f32 %v309_v50, %v307_v21  ;;  %v314_v63 = vmul.f32 %v310_v51, %v307_v21  ;;  %v311_v3 = vmul.f32 %v309_v50, %v303_v35  ;;  %v312_v4 = vmul.f32 %v310_v51, %v303_v35  ;;  %630 = vmatpush.bf16.msra.mxu0 %v821_v55 }
  0xa2   : > { %v330_v35 = vmul.f32 %v328_v61, %v1142_v17  ;;  %v1192_v17 = vld [vmem:[%s1249_s1 + $0x18] sm:$0xf]  ;;  %644 = vmatpush.bf16.msra.mxu1 %v829_v56 }
  0xa3   : > { %v317_v19 = vadd.f32 %v313_v62, %v299_v7  ;;  %v318_v21 = vadd.f32 %v314_v63, %v300_v8  ;;  %v315_v14 = vadd.f32 %v311_v3, %v297_v13  ;;  %v316_v22 = vadd.f32 %v312_v4, %v298_v15 }
  0xa4   : > { %v400_v54 = vperm.slane %v1192_v17, 0  ;;  %v418_v2 = vperm.slane %v1192_v17, 1  ;;  %v435_v3 = vperm.slane %v1187_v45, 2  ;;  %v436_v4 = vperm.slane %v1192_v17, 2 }
  0xa5   : > { %v1165_v38 = vpop.permute.xlu2 %378  ;;  %v333_v43 = vadd.f32 %v329_v34, %v315_v14  ;;  %v334_v44 = vadd.f32 %v330_v35, %v316_v22  ;;  %v453_v15 = vperm.slane %v1187_v45, 3 }
  0xa6   : > { %v385_v62 = vmul.f32 %v381_v37, %v1165_v38  ;;  %v386_v63 = vmul.f32 %v382_v39, %v1165_v38 }
  0xa7   : > { %v351_v57 = vadd.f32 %v347_v41, %v333_v43  ;;  %v352_v25 = vadd.f32 %v348_v42, %v334_v44  ;;  %v465_v42 = vperm.slane %v463_v33, 0  ;;  %v466_v43 = vperm.slane %v463_v33, 1 }
  0xa9   : > { %v325_v26 = vpop.permute.xlu1 %324  ;;  %v343_v0 = vpop.permute.xlu0 %342 }
  0xaa   : > { %v331_v9 = vmul.f32 %v327_v59, %v325_v26  ;;  %v332_v10 = vmul.f32 %v328_v61, %v325_v26  ;;  %v349_v30 = vmul.f32 %v345_v16, %v343_v0  ;;  %v350_v31 = vmul.f32 %v346_v18, %v343_v0 }
  0xab   : > { %v454_v16 = vperm.slane %v1192_v17, 3 }
  0xac   : > { %v335_v29 = vadd.f32 %v331_v9, %v317_v19  ;;  %v336_v26 = vadd.f32 %v332_v10, %v318_v21 }
  0xae   : > { %v1172_v5 = vpop.permute.xlu2 %410  ;;  %v353_v46 = vadd.f32 %v349_v30, %v335_v29  ;;  %v354_v47 = vadd.f32 %v350_v31, %v336_v26 }
  0xaf   : > { %v419_v26 = vmul.f32 %v417_v1, %v1172_v5  ;;  %v420_v30 = vmul.f32 %v418_v2, %v1172_v5 }
  0xb0   : > { %v371_v60 = vadd.f32 %v367_v27, %v353_v46  ;;  %v372_v61 = vadd.f32 %v368_v28, %v354_v47 }
  0xb2   : > { %v1162_v36 = vpop.permute.xlu1 %356  ;;  %v393_v40 = vpop.permute.xlu0 %392  ;;  %v389_v38 = vadd.f32 %v385_v62, %v371_v60  ;;  %v390_v13 = vadd.f32 %v386_v63, %v372_v61 }
  0xb3   : > { %v365_v50 = vmul.f32 %v363_v23, %v1162_v36  ;;  %v366_v51 = vmul.f32 %v364_v24, %v1162_v36  ;;  %v401_v11 = vmul.f32 %v399_v53, %v393_v40  ;;  %v402_v12 = vmul.f32 %v400_v54, %v393_v40 }
  0xb5   : > { %v369_v36 = vadd.f32 %v365_v50, %v351_v57  ;;  %v370_v0 = vadd.f32 %v366_v51, %v352_v25 }
  0xb7   : > { %v429_v52 = vpop.permute.xlu2 %428 }
  0xb8   : > { %v437_v17 = vmul.f32 %v435_v3, %v429_v52  ;;  %v438_v27 = vmul.f32 %v436_v4, %v429_v52 }
  0xbb   : > { %v375_v6 = vpop.permute.xlu1 %374  ;;  %v433_v9 = vpop.permute.xlu0 %432 }
  0xbc   : > { %v383_v58 = vmul.f32 %v381_v37, %v375_v6  ;;  %v384_v59 = vmul.f32 %v382_v39, %v375_v6  ;;  %v439_v19 = vmul.f32 %v435_v3, %v433_v9  ;;  %v440_v21 = vmul.f32 %v436_v4, %v433_v9 }
  0xbe   : > { %v387_v6 = vadd.f32 %v383_v58, %v369_v36  ;;  %v388_v10 = vadd.f32 %v384_v59, %v370_v0 }
  0xc0   : > { %v451_v14 = vpop.permute.xlu2 %450  ;;  %v405_v31 = vadd.f32 %v401_v11, %v387_v6  ;;  %v406_v32 = vadd.f32 %v402_v12, %v388_v10  ;;  %v926_v6 = vld [vmem:[%s1252_s4] ss:$0 sm:$0xff] }
  0xc1   : > { %v457_v37 = vmul.f32 %v453_v15, %v451_v14  ;;  %v458_v39 = vmul.f32 %v454_v16, %v451_v14 }
  0xc2   : > { %v423_v44 = vadd.f32 %v419_v26, %v405_v31  ;;  %v424_v45 = vadd.f32 %v420_v30, %v406_v32 }
  0xc4   : > { %v397_v48 = vpop.permute.xlu1 %396  ;;  %v441_v20 = vadd.f32 %v437_v17, %v423_v44  ;;  %v442_v49 = vadd.f32 %v438_v27, %v424_v45 }
  0xc5   : > { %v403_v7 = vmul.f32 %v399_v53, %v397_v48  ;;  %v404_v8 = vmul.f32 %v400_v54, %v397_v48 }
  0xc7   : > { %v407_v22 = vadd.f32 %v403_v7, %v389_v38  ;;  %v408_v23 = vadd.f32 %v404_v8, %v390_v13 }
  0xcd   : > { %v415_v18 = vpop.permute.xlu1 %414 }
  0xce   : > { %v421_v24 = vmul.f32 %v417_v1, %v415_v18  ;;  %v422_v29 = vmul.f32 %v418_v2, %v415_v18 }
  0xd0   : > { %v425_v34 = vadd.f32 %v421_v24, %v407_v22  ;;  %v426_v35 = vadd.f32 %v422_v29, %v408_v23 }
  0xd2   : > { %v443_v40 = vadd.f32 %v439_v19, %v425_v34  ;;  %v444_v41 = vadd.f32 %v440_v21, %v426_v35 }
  0xd4   : > { %v461_v28 = vadd.f32 %v457_v37, %v443_v40  ;;  %v462_v5 = vadd.f32 %v458_v39, %v444_v41 }
  0xd6   : > { %v471_v46 = vsub.f32 %v461_v28, %v465_v42  ;;  %v472_v47 = vsub.f32 %v462_v5, %v466_v43  ;;  %v447_v48 = vpop.permute.xlu1 %446 }
  0xd7   : > { %v455_v50 = vmul.f32 %v453_v15, %v447_v48  ;;  %v456_v51 = vmul.f32 %v454_v16, %v447_v48 }
  0xd8   : > { %v475_v53 = vmul.f32 %v471_v46, %v471_v46  ;;  %v476_v54 = vmul.f32 %v472_v47, %v472_v47 }
  0xd9   : > { %v459_v55 = vadd.f32 %v455_v50, %v441_v20  ;;  %v460_v56 = vadd.f32 %v456_v51, %v442_v49 }
  0xda   : > { %v479_v57 = vsub.f32 0.0, %v475_v53  ;;  %v480_v25 = vsub.f32 0.0, %v476_v54 }
  0xdb   : > { %v469_v58 = vsub.f32 %v459_v55, %v465_v42  ;;  %v470_v59 = vsub.f32 %v460_v56, %v466_v43 }
  0xdc   : > { %v485_v60 = vmul.f32 1.442695, %v479_v57  ;;  %v487_v62 = vmul.f32 1.442695, %v480_v25 }
  0xdd   : > { %v473_v61 = vmul.f32 %v469_v58, %v469_v58  ;;  %v474_v52 = vmul.f32 %v470_v59, %v470_v59 }
  0xde   : > { %927 = vpow2.f32 %v485_v60 }
  0xdf   : > { %v477_v63 = vsub.f32 0.0, %v473_v61  ;;  %v478_v36 = vsub.f32 0.0, %v474_v52  ;;  %929 = vpow2.f32 %v487_v62 }
  0xe1   : > { %v481_v0 = vmul.f32 1.442695, %v477_v63  ;;  %v483_v1 = vmul.f32 1.442695, %v478_v36 }
  0xe3   : > { %931 = vpow2.f32 %v481_v0 }
  0xe4   : > { %933 = vpow2.f32 %v483_v1  ;;  %v928_v2 = vpop.eup %927 }
  0xe5   : > { %v930_v3 = vpop.eup %929 }
  0xe9   : > { %v932_v4 = vpop.eup %931 }
  0xea   : > { %v934_v7 = vpop.eup %933  ;;  %v489_v8 = vpack.c.bf16 %v928_v2, %v932_v4 }
  0xeb   : > { %v490_v9 = vpack.c.bf16 %v930_v3, %v934_v7 }
  0xec   : > { %631 = vmatmul.bf16.vlgmr.msra.gmra.mxu0 %v489_v8 }
  0xed   : > { %645 = vmatmul.bf16.vlgmr.msra.gmra.mxu1 %v490_v9 }
 0x169   : > { %v632_v10 = vpop.f32.mrf.mxu0 }
 0x16a   : > { %v633_v11 = vadd.f32 %v926_v6, %v632_v10  ;;  %v646_v12 = vpop.f32.mrf.mxu1 }
 0x16c   : > { %v647_v38 = vadd.f32 %v646_v12, %v633_v11 }
 0x16e   : > { %651 = vst [vmem:[%s235_s16] sm:$0xff] %v647_v38 }
 0x171   : > { %v634_v13 = vpop.f32.mrf.mxu0 }
 0x172   : > { %v635_v15 = vadd.f32 %v926_v6, %v634_v13  ;;  %v648_v16 = vpop.f32.mrf.mxu1 }
 0x174   : > { %v649_v18 = vadd.f32 %v648_v16, %v635_v15 }
 0x176   : > { %652 = vst [vmem:[%s235_s16 + $0x8] sm:$0xff] %v649_v18 }
 0x177   : > { %992 = shalt.err (!%p989_p8)
}
 0x178   : > { %s1048_s11 = smov 128   ;;  %s1049_s14 = smov 8  }
 0x179   : > { %842 = dma.vmem_to_hbm [thread:$0]  (%p1118_p5), %s667_s26, 256, %s669_s30, %s654_s6, %s1048_s11, %s1048_s11, %s1049_s14  }
 0x17a PF: > { %p854_p9 = scmp.ge.s32.totalorder %s1031_s21, 2  ;;  %s683_s15 = sand.u32 1, %s1019_s18  }
 0x17b   : > { %s684_s16 = scalar_lea.sflag [#allocation4], %s683_s15 }
 0x17c   : > { %p849_p10 = pnand %p854_p9, %p1122_p6 }
 0x17e   : > { %p850_p11 = pneg %p849_p10 }
 0x180   : > { %1014 = dma.done.wait (%p850_p11), %s684_s16, 256  }
 0x181   : > { %1016 = vsyncadd (%p850_p11), %s684_s16, 4294967040  ;;  %p16_p12 = scmp.ge.s32.totalorder %s1105_s24, 6   ;;  %s1256_s18 = smov %s1023_s19 }
 0x182   : > { %s1257_s19 = smov %s1027_s20  ;;  %s1258_s20 = smov %s1116_s27 }
 0x183   : > { %s1259_s21 = smov %s1105_s24  ;;  %18 = sbr.rel (!%p16_p12) target bundleno = 4 (0x4), region = 80 }
 0x188   :  { %690 = vsyncpa [#allocation3], 1 }
 0x189   :  { %692 = vsyncpa [#allocation3 + $0x1], 1 }
 0x18a   :  { %693 = vsyncpa [#allocation4], 1 }
 0x18b   :  { %695 = vsyncpa [#allocation4 + $0x1], 1 }

</bundles_post_ra>
